<compile_context>
chip_gen: v6e
topology: v6e:2x2x1
jax: 0.10.0
libtpu: 0.0.40
codegen_flags: <defaults>
</compile_context>

<pallas_src>
import functools

import jax
import jax.numpy as jnp
from jax import lax
from jax.experimental import pallas as pl
from jax.experimental.pallas import tpu as pltpu


# --------------------------------------------------------------------------- kernels
def _stats_kernel(patches_ref, w_ref, sc_ref, qc_ref, sp_ref, qp_ref, *, cin):
    """Phase 1: per-channel sum / sum-of-squares of y = [conv(no bias) ; maxpool].

    Zero-padded spatial columns contribute exactly 0 (conv has no bias, pool of zeros
    is zero), so no lane mask is needed. Along-lane reductions go through the MXU
    (ones mat-vec). Accumulators are the resident output blocks themselves."""
    @pl.when((pl.program_id(1) == 0) & (pl.program_id(2) == 0))
    def _():
        sc_ref[...] = jnp.zeros_like(sc_ref)
        qc_ref[...] = jnp.zeros_like(qc_ref)
        sp_ref[...] = jnp.zeros_like(sp_ref)
        qp_ref[...] = jnp.zeros_like(qp_ref)

    p = patches_ref[0]                                                     # (9*Cin, TS)
    conv = jnp.dot(w_ref[...], p, preferred_element_type=jnp.float32)     # (Cc,   TS)
    # 2x2/stride-2 maxpool == max over im2col taps (kh,kw) in {1,2}x{1,2} (even H/W).
    pool = jnp.maximum(jnp.maximum(p[4 * cin:5 * cin], p[5 * cin:6 * cin]),
                       jnp.maximum(p[7 * cin:8 * cin], p[8 * cin:9 * cin]))  # (Cin, TS)

    ones = jnp.ones((p.shape[1], 1), jnp.float32)
    sc_ref[0] = sc_ref[0] + jnp.dot(conv, ones, preferred_element_type=jnp.float32)
    qc_ref[0] = qc_ref[0] + jnp.dot(conv * conv, ones, preferred_element_type=jnp.float32)
    sp_ref[0] = sp_ref[0] + jnp.dot(pool, ones, preferred_element_type=jnp.float32)
    qp_ref[0] = qp_ref[0] + jnp.dot(pool * pool, ones, preferred_element_type=jnp.float32)


def _apply_kernel(patches_ref, w_ref, scale_ref, shift_ref, o_ref, *, cin, cc):
    """Phase 2: recompute conv/pool per tile, apply folded BN (scale/shift) + ReLU.

    conv and pool are stored directly into sublane slices of the (1, Cout, TS) output
    block -- no (Cout, TS) concatenate temporary."""
    p = patches_ref[0]                                                     # (9*Cin, TS)
    conv = jnp.dot(w_ref[...], p, preferred_element_type=jnp.float32)     # (Cc,   TS)
    pool = jnp.maximum(jnp.maximum(p[4 * cin:5 * cin], p[5 * cin:6 * cin]),
                       jnp.maximum(p[7 * cin:8 * cin], p[8 * cin:9 * cin]))  # (Cin, TS)
    sc = scale_ref[...]                                                    # (Cout, 1)
    sh = shift_ref[...]                                                    # (Cout, 1)
    o_ref[0, :cc, :] = jnp.maximum(conv * sc[:cc] + sh[:cc], 0.0).astype(o_ref.dtype)
    o_ref[0, cc:, :] = jnp.maximum(pool * sc[cc:] + sh[cc:], 0.0).astype(o_ref.dtype)


# --------------------------------------------------------------------------- helpers
def _round_up(v, m):
    return (v + m - 1) // m * m


def _pick_tile_s(sp, cin, cout, override):
    """Pick the spatial tile (lanes). Sized from the actual streamed footprint:
    2x double-buffered (patches + out) blocks + ~1x of in-kernel temporaries."""
    try:
        vmem_cap = int(pltpu.get_tpu_info().vmem_capacity_bytes)  # 64 MiB v7x, 128 MiB v5e/v6e
    except Exception:
        vmem_cap = 64 * 1024 * 1024
    bytes_per_col = 3 * (9 * cin + cout) * 4
    budget = min(vmem_cap, 128 * 1024 * 1024) // 2 - 4 * 1024 * 1024
    cap = max(128, min(16384, (budget // bytes_per_col) // 128 * 128))
    if override is not None:
        cap = min(cap, max(128, (int(override) // 128) * 128))
    ts = 128
    for t in range(cap // 128, 0, -1):          # largest 128-multiple dividing Sp
        if sp % (128 * t) == 0:
            ts = 128 * t
            break
    return ts, vmem_cap, bytes_per_col


# --------------------------------------------------------------------------- wrapper
def _downsampler_block_impl(x, w, b, gamma, beta, eps=1e-3, tile_s=None):
    """x: (N, Cin, H, W) f32; w: (Cout-Cin, Cin, 3, 3); b: (Cout-Cin,); gamma/beta: (Cout,).
       Returns (N, Cout, H//2, W//2) — conv(3x3,s2,p1) || maxpool(2x2,s2) -> BN(train) -> ReLU."""
    N, Cin, H, W = x.shape
    Cc = w.shape[0]
    Cout = Cc + Cin
    assert H % 2 == 0 and W % 2 == 0, "even H/W required (pool taps reuse conv taps)"
    Ho, Wo = H // 2, W // 2
    S = Ho * Wo                    # per-image output pixels
    M = N * S                      # total output pixels (BN sample count)
    Sp = _round_up(S, 128)

    tS, vmem_cap, bytes_per_col = _pick_tile_s(Sp, Cin, Cout, tile_s)
    nk = Sp // tS
    n_split = 2 if (nk % 2 == 0 and nk >= 2) else 1     # 2-way phase-1 split (v7x megacore)
    nk_half = nk // n_split
    vmem_limit = int(min(vmem_cap - 4 * 1024 * 1024,
                         max(bytes_per_col * tS + 2 * Cc * 9 * Cin * 4 + 16 * 1024 * 1024,
                             16 * 1024 * 1024)))

    # --- im2col in per-image layout (N, 9*Cin, Sp): taps/channels on sublanes, spatial on lanes.
    x_pad = jnp.pad(x, ((0, 0), (0, 0), (1, 1), (1, 1)))
    taps = [x_pad[:, :, kh:kh + 2 * Ho:2, kw:kw + 2 * Wo:2]
            for kh in range(3) for kw in range(3)]                          # each (N,Cin,Ho,Wo)
    patches = jnp.stack(taps, axis=1).reshape(N, 9 * Cin, S).astype(jnp.float32)
    if Sp != S:
        patches = jnp.pad(patches, ((0, 0), (0, 0), (0, Sp - S)))

    # PyTorch (Cc, Cin, 3, 3) -> (Cc, 9*Cin) matching the (kh, kw, ci) patch-row order.
    w_mat = jnp.transpose(w, (0, 2, 3, 1)).reshape(Cc, 9 * Cin).astype(jnp.float32)

    # --- phase 1: batch statistics (2-way split x image x spatial-tile grid reduction) ------
    sum_c, ssq_c, sum_p, ssq_p = pl.pallas_call(
        functools.partial(_stats_kernel, cin=Cin),
        grid=(n_split, N, nk_half),
        in_specs=[pl.BlockSpec((1, 9 * Cin, tS), lambda c, n, k: (n, 0, c * nk_half + k)),
                  pl.BlockSpec((Cc, 9 * Cin), lambda c, n, k: (0, 0))],
        out_specs=(pl.BlockSpec((1, Cc, 1), lambda c, n, k: (c, 0, 0)),
                   pl.BlockSpec((1, Cc, 1), lambda c, n, k: (c, 0, 0)),
                   pl.BlockSpec((1, Cin, 1), lambda c, n, k: (c, 0, 0)),
                   pl.BlockSpec((1, Cin, 1), lambda c, n, k: (c, 0, 0))),
        out_shape=(jax.ShapeDtypeStruct((n_split, Cc, 1), jnp.float32),
                   jax.ShapeDtypeStruct((n_split, Cc, 1), jnp.float32),
                   jax.ShapeDtypeStruct((n_split, Cin, 1), jnp.float32),
                   jax.ShapeDtypeStruct((n_split, Cin, 1), jnp.float32)),
        compiler_params=pltpu.CompilerParams(
            dimension_semantics=("parallel", "arbitrary", "arbitrary"),
            vmem_limit_bytes=vmem_limit),
    )(patches, w_mat)

    # --- fold BN (training-mode batch stats, biased var) into scale/shift --------------------
    # Note: the conv bias b cancels exactly under training-mode BN (mean subtraction), so it
    # never needs to enter the kernels. Single-pass E[x^2]-E[x]^2; clamp for safety.
    s0 = jnp.concatenate([jnp.sum(sum_c, axis=0)[:, 0], jnp.sum(sum_p, axis=0)[:, 0]])
    q0 = jnp.concatenate([jnp.sum(ssq_c, axis=0)[:, 0], jnp.sum(ssq_p, axis=0)[:, 0]])
    mean0 = s0 / M
    var = jnp.maximum(q0 / M - mean0 * mean0, 0.0)
    inv = lax.rsqrt(var + eps)
    scale = gamma.astype(jnp.float32) * inv
    shift = beta.astype(jnp.float32) - mean0 * scale

    # --- phase 2: recompute conv/pool, normalize + ReLU; output is NCHW up to a pure reshape --
    out = pl.pallas_call(
        functools.partial(_apply_kernel, cin=Cin, cc=Cc),
        grid=(N, nk),
        in_specs=[pl.BlockSpec((1, 9 * Cin, tS), lambda n, k: (n, 0, k)),
                  pl.BlockSpec((Cc, 9 * Cin), lambda n, k: (0, 0)),
                  pl.BlockSpec((Cout, 1), lambda n, k: (0, 0)),
                  pl.BlockSpec((Cout, 1), lambda n, k: (0, 0))],
        out_specs=pl.BlockSpec((1, Cout, tS), lambda n, k: (n, 0, k)),
        out_shape=jax.ShapeDtypeStruct((N, Cout, Sp), x.dtype),
        compiler_params=pltpu.CompilerParams(
            dimension_semantics=("parallel", "parallel"),
            vmem_limit_bytes=vmem_limit),
    )(patches, w_mat, scale.reshape(Cout, 1), shift.reshape(Cout, 1))

    return out[:, :, :S].reshape(N, Cout, Ho, Wo)


downsampler_block = jax.jit(_downsampler_block_impl, static_argnames=("tile_s",))


# --------------------------------------------------------------------------- reference
def reference(x, w, b, gamma, beta, eps=1e-3):
    """Pure-JAX reference mirroring the PyTorch DownsamplerBlock forward (NCHW)."""
    x1 = lax.reduce_window(x, -jnp.inf, lax.max, (1, 1, 2, 2), (1, 1, 2, 2), "VALID")
    x2 = lax.conv_general_dilated(x, w, (2, 2), ((1, 1), (1, 1)),
                                  dimension_numbers=("NCHW", "OIHW", "NCHW"))
    x2 = x2 + b[None, :, None, None]
    diffY = x2.shape[2] - x1.shape[2]
    diffX = x2.shape[3] - x1.shape[3]
    x1 = jnp.pad(x1, ((0, 0), (0, 0),
                      (diffY // 2, diffY - diffY // 2),
                      (diffX // 2, diffX - diffX // 2)))
    y = jnp.concatenate([x2, x1], axis=1)
    mean = y.mean(axis=(0, 2, 3), keepdims=True)
    var = ((y - mean) ** 2).mean(axis=(0, 2, 3), keepdims=True)
    y = (y - mean) / jnp.sqrt(var + eps) * gamma[None, :, None, None] + beta[None, :, None, None]
    return jnp.maximum(y, 0.0)


# --------------------------------------------------------------------------- test
if __name__ == "__main__":
    def run_case(key, N, Cin, Cout, H, W, tile_s):
        k1, k2, k3, k4, k5 = jax.random.split(key, 5)
        Cc = Cout - Cin
        x = jax.random.normal(k1, (N, Cin, H, W), jnp.float32)
        w = 0.1 * jax.random.normal(k2, (Cc, Cin, 3, 3), jnp.float32)
        b = 0.1 * jax.random.normal(k3, (Cc,), jnp.float32)
        gamma = 1.0 + 0.1 * jax.random.normal(k4, (Cout,), jnp.float32)
        beta = 0.1 * jax.random.normal(k5, (Cout,), jnp.float32)

        out = jax.block_until_ready(downsampler_block(x, w, b, gamma, beta, tile_s=tile_s))
        ref = reference(x, w, b, gamma, beta)
        assert out.shape == (N, Cout, H // 2, W // 2), out.shape
        err = float(jnp.max(jnp.abs(out - ref)))
        assert jnp.allclose(out, ref, atol=1e-4, rtol=1e-4), err

    key = jax.random.PRNGKey(0)
    k_a, k_b = jax.random.split(key)

    # Encoder.initial_block = DownsamplerBlock(3, 32); forced 128-wide tiles -> multi-tile grid,
    # exercising the split (2-core) phase-1 reduction and the unaligned conv/pool sublane split.
    run_case(k_a, N=2, Cin=3, Cout=32, H=32, W=32, tile_s=128)
    # Ho*Wo not a multiple of 128 -> exercises lane padding (zero columns drop out of stats).
    run_case(k_b, N=1, Cin=4, Cout=8, H=10, W=14, tile_s=None)

    print("KERNEL_OK")
</pallas_src>

<mosaic_0001>
module attributes {stable_mosaic.version = 11 : i64} {
  func.func @_stats_kernel(%arg0: i32, %arg1: i32, %arg2: i32, %arg3: memref<1x27x128xf32, #tpu.memory_space<vmem>>, %arg4: memref<29x27xf32, #tpu.memory_space<vmem>>, %arg5: memref<1x29x1xf32, #tpu.memory_space<vmem>>, %arg6: memref<1x29x1xf32, #tpu.memory_space<vmem>>, %arg7: memref<1x3x1xf32, #tpu.memory_space<vmem>>, %arg8: memref<1x3x1xf32, #tpu.memory_space<vmem>>) attributes {dimension_semantics = [#tpu.dimension_semantics<parallel>, #tpu.dimension_semantics<arbitrary>, #tpu.dimension_semantics<arbitrary>], iteration_bounds = array<i64: 2, 2, 1>, scalar_prefetch = 0 : i64, scratch_operands = 0 : i64, tpu.core_type = #tpu.core_type<tc>, window_params = [{transform_indices = @transform_0, window_bounds = array<i64: 1, 27, 128>}, {pipeline_mode = #tpu.pipeline_mode<synchronous>, transform_indices = @transform_1, window_bounds = array<i64: 29, 27>}, {transform_indices = @transform_2, window_bounds = array<i64: 1, 29, 1>}, {transform_indices = @transform_3, window_bounds = array<i64: 1, 29, 1>}, {transform_indices = @transform_4, window_bounds = array<i64: 1, 3, 1>}, {transform_indices = @transform_5, window_bounds = array<i64: 1, 3, 1>}]} {
    %c0_i32 = arith.constant 0 : i32
    %0 = arith.cmpi eq, %arg1, %c0_i32 : i32
    %c0_i32_0 = arith.constant 0 : i32
    %1 = arith.cmpi eq, %arg2, %c0_i32_0 : i32
    %2 = arith.andi %0, %1 : i1
    %3 = arith.extui %2 : i1 to i32
    %c0_i32_1 = arith.constant 0 : i32
    %4 = arith.cmpi ne, %3, %c0_i32_1 : i32
    scf.if %4 {
      %cst_35 = arith.constant 0.000000e+00 : f32
      %47 = vector.broadcast %cst_35 : f32 to vector<1x29x1xf32>
      %c0_36 = arith.constant 0 : index
      %c0_37 = arith.constant 0 : index
      %c0_38 = arith.constant 0 : index
      %48 = vector.load %arg5[%c0_36, %c0_37, %c0_38] : memref<1x29x1xf32, #tpu.memory_space<vmem>>, vector<1x29x1xf32>
      tpu.vector_store %arg5[%c0_36, %c0_37, %c0_38], %47 {strides = array<i32>} : memref<1x29x1xf32, #tpu.memory_space<vmem>>, vector<1x29x1xf32>,
      %cst_39 = arith.constant 0.000000e+00 : f32
      %49 = vector.broadcast %cst_39 : f32 to vector<1x29x1xf32>
      %c0_40 = arith.constant 0 : index
      %c0_41 = arith.constant 0 : index
      %c0_42 = arith.constant 0 : index
      %50 = vector.load %arg6[%c0_40, %c0_41, %c0_42] : memref<1x29x1xf32, #tpu.memory_space<vmem>>, vector<1x29x1xf32>
      tpu.vector_store %arg6[%c0_40, %c0_41, %c0_42], %49 {strides = array<i32>} : memref<1x29x1xf32, #tpu.memory_space<vmem>>, vector<1x29x1xf32>,
      %cst_43 = arith.constant 0.000000e+00 : f32
      %51 = vector.broadcast %cst_43 : f32 to vector<1x3x1xf32>
      %c0_44 = arith.constant 0 : index
      %c0_45 = arith.constant 0 : index
      %c0_46 = arith.constant 0 : index
      %52 = vector.load %arg7[%c0_44, %c0_45, %c0_46] : memref<1x3x1xf32, #tpu.memory_space<vmem>>, vector<1x3x1xf32>
      tpu.vector_store %arg7[%c0_44, %c0_45, %c0_46], %51 {strides = array<i32>} : memref<1x3x1xf32, #tpu.memory_space<vmem>>, vector<1x3x1xf32>,
      %cst_47 = arith.constant 0.000000e+00 : f32
      %53 = vector.broadcast %cst_47 : f32 to vector<1x3x1xf32>
      %c0_48 = arith.constant 0 : index
      %c0_49 = arith.constant 0 : index
      %c0_50 = arith.constant 0 : index
      %54 = vector.load %arg8[%c0_48, %c0_49, %c0_50] : memref<1x3x1xf32, #tpu.memory_space<vmem>>, vector<1x3x1xf32>
      tpu.vector_store %arg8[%c0_48, %c0_49, %c0_50], %53 {strides = array<i32>} : memref<1x3x1xf32, #tpu.memory_space<vmem>>, vector<1x3x1xf32>,
    } else {
    }
    %c0 = arith.constant 0 : index
    %c0_2 = arith.constant 0 : index
    %c0_3 = arith.constant 0 : index
    %5 = vector.load %arg3[%c0, %c0_2, %c0_3] : memref<1x27x128xf32, #tpu.memory_space<vmem>>, vector<1x27x128xf32>
    %6 = vector.shape_cast %5 : vector<1x27x128xf32> to vector<27x128xf32>
    %c0_4 = arith.constant 0 : index
    %c0_5 = arith.constant 0 : index
    %7 = vector.load %arg4[%c0_4, %c0_5] : memref<29x27xf32, #tpu.memory_space<vmem>>, vector<29x27xf32>
    %cst = arith.constant dense<0.000000e+00> : vector<29x128xf32>
    %8 = tpu.matmul %7, %6, %cst {dimension_numbers = #tpu.dot_dimension_numbers<[1], [0], [0], [1], [0, 0, 1, 1], [], []>} : vector<29x27xf32>, vector<27x128xf32>, vector<29x128xf32> -> vector<29x128xf32>
    %9 = vector.extract_strided_slice %6 {offsets = [12, 0], sizes = [3, 128], strides = [1, 1]} : vector<27x128xf32> to vector<3x128xf32>
    %10 = vector.extract_strided_slice %6 {offsets = [15, 0], sizes = [3, 128], strides = [1, 1]} : vector<27x128xf32> to vector<3x128xf32>
    %11 = arith.maximumf %9, %10 : vector<3x128xf32>
    %12 = vector.extract_strided_slice %6 {offsets = [21, 0], sizes = [3, 128], strides = [1, 1]} : vector<27x128xf32> to vector<3x128xf32>
    %13 = vector.extract_strided_slice %6 {offsets = [24, 0], sizes = [3, 128], strides = [1, 1]} : vector<27x128xf32> to vector<3x128xf32>
    %14 = arith.maximumf %12, %13 : vector<3x128xf32>
    %15 = arith.maximumf %11, %14 : vector<3x128xf32>
    %cst_6 = arith.constant 1.000000e+00 : f32
    %16 = vector.broadcast %cst_6 : f32 to vector<128x1xf32>
    %c0_7 = arith.constant 0 : index
    %c0_8 = arith.constant 0 : index
    %c0_9 = arith.constant 0 : index
    %17 = vector.load %arg5[%c0_7, %c0_8, %c0_9] : memref<1x29x1xf32, #tpu.memory_space<vmem>>, vector<1x29x1xf32>
    %18 = vector.shape_cast %17 : vector<1x29x1xf32> to vector<29x1xf32>
    %cst_10 = arith.constant dense<0.000000e+00> : vector<29x1xf32>
    %19 = tpu.matmul %8, %16, %cst_10 {dimension_numbers = #tpu.dot_dimension_numbers<[1], [0], [0], [1], [0, 0, 1, 1], [], []>} : vector<29x128xf32>, vector<128x1xf32>, vector<29x1xf32> -> vector<29x1xf32>
    %20 = arith.addf %18, %19 : vector<29x1xf32>
    %c0_11 = arith.constant 0 : index
    %c0_12 = arith.constant 0 : index
    %c0_13 = arith.constant 0 : index
    %21 = vector.load %arg5[%c0_11, %c0_12, %c0_13] : memref<1x29x1xf32, #tpu.memory_space<vmem>>, vector<1x29x1xf32>
    %22 = vector.shape_cast %21 : vector<1x29x1xf32> to vector<29x1xf32>
    %23 = vector.shape_cast %20 : vector<29x1xf32> to vector<1x29x1xf32>
    tpu.vector_store %arg5[%c0_11, %c0_12, %c0_13], %23 {strides = array<i32>} : memref<1x29x1xf32, #tpu.memory_space<vmem>>, vector<1x29x1xf32>,
    %c0_14 = arith.constant 0 : index
    %c0_15 = arith.constant 0 : index
    %c0_16 = arith.constant 0 : index
    %24 = vector.load %arg6[%c0_14, %c0_15, %c0_16] : memref<1x29x1xf32, #tpu.memory_space<vmem>>, vector<1x29x1xf32>
    %25 = vector.shape_cast %24 : vector<1x29x1xf32> to vector<29x1xf32>
    %26 = arith.mulf %8, %8 : vector<29x128xf32>
    %cst_17 = arith.constant dense<0.000000e+00> : vector<29x1xf32>
    %27 = tpu.matmul %26, %16, %cst_17 {dimension_numbers = #tpu.dot_dimension_numbers<[1], [0], [0], [1], [0, 0, 1, 1], [], []>} : vector<29x128xf32>, vector<128x1xf32>, vector<29x1xf32> -> vector<29x1xf32>
    %28 = arith.addf %25, %27 : vector<29x1xf32>
    %c0_18 = arith.constant 0 : index
    %c0_19 = arith.constant 0 : index
    %c0_20 = arith.constant 0 : index
    %29 = vector.load %arg6[%c0_18, %c0_19, %c0_20] : memref<1x29x1xf32, #tpu.memory_space<vmem>>, vector<1x29x1xf32>
    %30 = vector.shape_cast %29 : vector<1x29x1xf32> to vector<29x1xf32>
    %31 = vector.shape_cast %28 : vector<29x1xf32> to vector<1x29x1xf32>
    tpu.vector_store %arg6[%c0_18, %c0_19, %c0_20], %31 {strides = array<i32>} : memref<1x29x1xf32, #tpu.memory_space<vmem>>, vector<1x29x1xf32>,
    %c0_21 = arith.constant 0 : index
    %c0_22 = arith.constant 0 : index
    %c0_23 = arith.constant 0 : index
    %32 = vector.load %arg7[%c0_21, %c0_22, %c0_23] : memref<1x3x1xf32, #tpu.memory_space<vmem>>, vector<1x3x1xf32>
    %33 = vector.shape_cast %32 : vector<1x3x1xf32> to vector<3x1xf32>
    %cst_24 = arith.constant dense<0.000000e+00> : vector<3x1xf32>
    %34 = tpu.matmul %15, %16, %cst_24 {dimension_numbers = #tpu.dot_dimension_numbers<[1], [0], [0], [1], [0, 0, 1, 1], [], []>} : vector<3x128xf32>, vector<128x1xf32>, vector<3x1xf32> -> vector<3x1xf32>
    %35 = arith.addf %33, %34 : vector<3x1xf32>
    %c0_25 = arith.constant 0 : index
    %c0_26 = arith.constant 0 : index
    %c0_27 = arith.constant 0 : index
    %36 = vector.load %arg7[%c0_25, %c0_26, %c0_27] : memref<1x3x1xf32, #tpu.memory_space<vmem>>, vector<1x3x1xf32>
    %37 = vector.shape_cast %36 : vector<1x3x1xf32> to vector<3x1xf32>
    %38 = vector.shape_cast %35 : vector<3x1xf32> to vector<1x3x1xf32>
    tpu.vector_store %arg7[%c0_25, %c0_26, %c0_27], %38 {strides = array<i32>} : memref<1x3x1xf32, #tpu.memory_space<vmem>>, vector<1x3x1xf32>,
    %c0_28 = arith.constant 0 : index
    %c0_29 = arith.constant 0 : index
    %c0_30 = arith.constant 0 : index
    %39 = vector.load %arg8[%c0_28, %c0_29, %c0_30] : memref<1x3x1xf32, #tpu.memory_space<vmem>>, vector<1x3x1xf32>
    %40 = vector.shape_cast %39 : vector<1x3x1xf32> to vector<3x1xf32>
    %41 = arith.mulf %15, %15 : vector<3x128xf32>
    %cst_31 = arith.constant dense<0.000000e+00> : vector<3x1xf32>
    %42 = tpu.matmul %41, %16, %cst_31 {dimension_numbers = #tpu.dot_dimension_numbers<[1], [0], [0], [1], [0, 0, 1, 1], [], []>} : vector<3x128xf32>, vector<128x1xf32>, vector<3x1xf32> -> vector<3x1xf32>
    %43 = arith.addf %40, %42 : vector<3x1xf32>
    %c0_32 = arith.constant 0 : index
    %c0_33 = arith.constant 0 : index
    %c0_34 = arith.constant 0 : index
    %44 = vector.load %arg8[%c0_32, %c0_33, %c0_34] : memref<1x3x1xf32, #tpu.memory_space<vmem>>, vector<1x3x1xf32>
    %45 = vector.shape_cast %44 : vector<1x3x1xf32> to vector<3x1xf32>
    %46 = vector.shape_cast %43 : vector<3x1xf32> to vector<1x3x1xf32>
    tpu.vector_store %arg8[%c0_32, %c0_33, %c0_34], %46 {strides = array<i32>} : memref<1x3x1xf32, #tpu.memory_space<vmem>>, vector<1x3x1xf32>,
    return
  }
  func.func @transform_0(%arg0: i32, %arg1: i32, %arg2: i32) -> (i32, i32, i32) {
    %c1_i32 = arith.constant 1 : i32
    %0 = arith.muli %arg0, %c1_i32 : i32
    %1 = arith.addi %0, %arg2 : i32
    %c0_i32 = arith.constant 0 : i32
    %c0_i32_0 = arith.constant 0 : i32
    return %arg1, %c0_i32, %1 : i32, i32, i32
  }
  func.func @transform_1(%arg0: i32, %arg1: i32, %arg2: i32) -> (i32, i32) {
    %c0_i32 = arith.constant 0 : i32
    %c0_i32_0 = arith.constant 0 : i32
    %c0_i32_1 = arith.constant 0 : i32
    return %c0_i32, %c0_i32_0 : i32, i32
  }
  func.func @transform_2(%arg0: i32, %arg1: i32, %arg2: i32) -> (i32, i32, i32) {
    %c0_i32 = arith.constant 0 : i32
    %c0_i32_0 = arith.constant 0 : i32
    %c0_i32_1 = arith.constant 0 : i32
    return %arg0, %c0_i32, %c0_i32_0 : i32, i32, i32
  }
  func.func @transform_3(%arg0: i32, %arg1: i32, %arg2: i32) -> (i32, i32, i32) {
    %c0_i32 = arith.constant 0 : i32
    %c0_i32_0 = arith.constant 0 : i32
    %c0_i32_1 = arith.constant 0 : i32
    return %arg0, %c0_i32, %c0_i32_0 : i32, i32, i32
  }
  func.func @transform_4(%arg0: i32, %arg1: i32, %arg2: i32) -> (i32, i32, i32) {
    %c0_i32 = arith.constant 0 : i32
    %c0_i32_0 = arith.constant 0 : i32
    %c0_i32_1 = arith.constant 0 : i32
    return %arg0, %c0_i32, %c0_i32_0 : i32, i32, i32
  }
  func.func @transform_5(%arg0: i32, %arg1: i32, %arg2: i32) -> (i32, i32, i32) {
    %c0_i32 = arith.constant 0 : i32
    %c0_i32_0 = arith.constant 0 : i32
    %c0_i32_1 = arith.constant 0 : i32
    return %arg0, %c0_i32, %c0_i32_0 : i32, i32, i32
  }
}

module attributes {stable_mosaic.version = 11 : i64} {
  func.func @_apply_kernel(%arg0: i32, %arg1: i32, %arg2: memref<1x27x128xf32, #tpu.memory_space<vmem>>, %arg3: memref<29x27xf32, #tpu.memory_space<vmem>>, %arg4: memref<32x1xf32, #tpu.memory_space<vmem>>, %arg5: memref<32x1xf32, #tpu.memory_space<vmem>>, %arg6: memref<1x32x128xf32, #tpu.memory_space<vmem>>) attributes {dimension_semantics = [#tpu.dimension_semantics<parallel>, #tpu.dimension_semantics<parallel>], iteration_bounds = array<i64: 2, 2>, scalar_prefetch = 0 : i64, scratch_operands = 0 : i64, tpu.core_type = #tpu.core_type<tc>, window_params = [{transform_indices = @transform_0, window_bounds = array<i64: 1, 27, 128>}, {pipeline_mode = #tpu.pipeline_mode<synchronous>, transform_indices = @transform_1, window_bounds = array<i64: 29, 27>}, {pipeline_mode = #tpu.pipeline_mode<synchronous>, transform_indices = @transform_2, window_bounds = array<i64: 32, 1>}, {pipeline_mode = #tpu.pipeline_mode<synchronous>, transform_indices = @transform_3, window_bounds = array<i64: 32, 1>}, {transform_indices = @transform_4, window_bounds = array<i64: 1, 32, 128>}]} {
    %c0 = arith.constant 0 : index
    %c0_0 = arith.constant 0 : index
    %c0_1 = arith.constant 0 : index
    %0 = vector.load %arg2[%c0, %c0_0, %c0_1] : memref<1x27x128xf32, #tpu.memory_space<vmem>>, vector<1x27x128xf32>
    %1 = vector.shape_cast %0 : vector<1x27x128xf32> to vector<27x128xf32>
    %c0_2 = arith.constant 0 : index
    %c0_3 = arith.constant 0 : index
    %2 = vector.load %arg3[%c0_2, %c0_3] : memref<29x27xf32, #tpu.memory_space<vmem>>, vector<29x27xf32>
    %cst = arith.constant dense<0.000000e+00> : vector<29x128xf32>
    %3 = tpu.matmul %2, %1, %cst {dimension_numbers = #tpu.dot_dimension_numbers<[1], [0], [0], [1], [0, 0, 1, 1], [], []>} : vector<29x27xf32>, vector<27x128xf32>, vector<29x128xf32> -> vector<29x128xf32>
    %4 = vector.extract_strided_slice %1 {offsets = [12, 0], sizes = [3, 128], strides = [1, 1]} : vector<27x128xf32> to vector<3x128xf32>
    %5 = vector.extract_strided_slice %1 {offsets = [15, 0], sizes = [3, 128], strides = [1, 1]} : vector<27x128xf32> to vector<3x128xf32>
    %6 = arith.maximumf %4, %5 : vector<3x128xf32>
    %7 = vector.extract_strided_slice %1 {offsets = [21, 0], sizes = [3, 128], strides = [1, 1]} : vector<27x128xf32> to vector<3x128xf32>
    %8 = vector.extract_strided_slice %1 {offsets = [24, 0], sizes = [3, 128], strides = [1, 1]} : vector<27x128xf32> to vector<3x128xf32>
    %9 = arith.maximumf %7, %8 : vector<3x128xf32>
    %10 = arith.maximumf %6, %9 : vector<3x128xf32>
    %c0_4 = arith.constant 0 : index
    %c0_5 = arith.constant 0 : index
    %11 = vector.load %arg4[%c0_4, %c0_5] : memref<32x1xf32, #tpu.memory_space<vmem>>, vector<32x1xf32>
    %c0_6 = arith.constant 0 : index
    %c0_7 = arith.constant 0 : index
    %12 = vector.load %arg5[%c0_6, %c0_7] : memref<32x1xf32, #tpu.memory_space<vmem>>, vector<32x1xf32>
    %13 = vector.extract_strided_slice %11 {offsets = [0, 0], sizes = [29, 1], strides = [1, 1]} : vector<32x1xf32> to vector<29x1xf32>
    %14 = vector.broadcast %13 : vector<29x1xf32> to vector<29x128xf32>
    %15 = arith.mulf %3, %14 : vector<29x128xf32>
    %16 = vector.extract_strided_slice %12 {offsets = [0, 0], sizes = [29, 1], strides = [1, 1]} : vector<32x1xf32> to vector<29x1xf32>
    %17 = vector.broadcast %16 : vector<29x1xf32> to vector<29x128xf32>
    %18 = arith.addf %15, %17 : vector<29x128xf32>
    %cst_8 = arith.constant 0.000000e+00 : f32
    %19 = vector.broadcast %cst_8 : f32 to vector<29x128xf32>
    %20 = arith.maximumf %18, %19 : vector<29x128xf32>
    %c0_9 = arith.constant 0 : index
    %c0_10 = arith.constant 0 : index
    %c0_11 = arith.constant 0 : index
    %21 = vector.load %arg6[%c0_9, %c0_10, %c0_11] : memref<1x32x128xf32, #tpu.memory_space<vmem>>, vector<1x29x128xf32>
    %22 = vector.shape_cast %21 : vector<1x29x128xf32> to vector<29x128xf32>
    %23 = vector.shape_cast %20 : vector<29x128xf32> to vector<1x29x128xf32>
    tpu.vector_store %arg6[%c0_9, %c0_10, %c0_11], %23 {strides = array<i32>} : memref<1x32x128xf32, #tpu.memory_space<vmem>>, vector<1x29x128xf32>,
    %24 = vector.extract_strided_slice %11 {offsets = [29, 0], sizes = [3, 1], strides = [1, 1]} : vector<32x1xf32> to vector<3x1xf32>
    %25 = vector.broadcast %24 : vector<3x1xf32> to vector<3x128xf32>
    %26 = arith.mulf %10, %25 : vector<3x128xf32>
    %27 = vector.extract_strided_slice %12 {offsets = [29, 0], sizes = [3, 1], strides = [1, 1]} : vector<32x1xf32> to vector<3x1xf32>
    %28 = vector.broadcast %27 : vector<3x1xf32> to vector<3x128xf32>
    %29 = arith.addf %26, %28 : vector<3x128xf32>
    %cst_12 = arith.constant 0.000000e+00 : f32
    %30 = vector.broadcast %cst_12 : f32 to vector<3x128xf32>
    %31 = arith.maximumf %29, %30 : vector<3x128xf32>
    %c0_13 = arith.constant 0 : index
    %c29 = arith.constant 29 : index
    %c0_14 = arith.constant 0 : index
    %32 = vector.load %arg6[%c0_13, %c29, %c0_14] : memref<1x32x128xf32, #tpu.memory_space<vmem>>, vector<1x3x128xf32>
    %33 = vector.shape_cast %32 : vector<1x3x128xf32> to vector<3x128xf32>
    %34 = vector.shape_cast %31 : vector<3x128xf32> to vector<1x3x128xf32>
    tpu.vector_store %arg6[%c0_13, %c29, %c0_14], %34 {strides = array<i32>} : memref<1x32x128xf32, #tpu.memory_space<vmem>>, vector<1x3x128xf32>,
    return
  }
  func.func @transform_0(%arg0: i32, %arg1: i32) -> (i32, i32, i32) {
    %c0_i32 = arith.constant 0 : i32
    %c0_i32_0 = arith.constant 0 : i32
    return %arg0, %c0_i32, %arg1 : i32, i32, i32
  }
  func.func @transform_1(%arg0: i32, %arg1: i32) -> (i32, i32) {
    %c0_i32 = arith.constant 0 : i32
    %c0_i32_0 = arith.constant 0 : i32
    %c0_i32_1 = arith.constant 0 : i32
    return %c0_i32, %c0_i32_0 : i32, i32
  }
  func.func @transform_2(%arg0: i32, %arg1: i32) -> (i32, i32) {
    %c0_i32 = arith.constant 0 : i32
    %c0_i32_0 = arith.constant 0 : i32
    %c0_i32_1 = arith.constant 0 : i32
    return %c0_i32, %c0_i32_0 : i32, i32
  }
  func.func @transform_3(%arg0: i32, %arg1: i32) -> (i32, i32) {
    %c0_i32 = arith.constant 0 : i32
    %c0_i32_0 = arith.constant 0 : i32
    %c0_i32_1 = arith.constant 0 : i32
    return %c0_i32, %c0_i32_0 : i32, i32
  }
  func.func @transform_4(%arg0: i32, %arg1: i32) -> (i32, i32, i32) {
    %c0_i32 = arith.constant 0 : i32
    %c0_i32_0 = arith.constant 0 : i32
    return %arg0, %c0_i32, %arg1 : i32, i32, i32
  }
}

</mosaic_0001>

<bundles_post_ra>
// kernel: _downsampler_block_impl.3
= control target key start
LH: loop header
LB: loop body
LE: loop exit
PB: predicated region body
PF: predicated region fallthrough
CT: control target
= control target key end

     0   :  { %s773_s15 = smov 0   ;;  %s775_s16 = smov 0   ;;  %s928_s0 = inlined_call_operand.vmem [shape: f32[2,27,256], index: 0, kind: input, shape index: {}]   ;;  %s929_s1 = inlined_call_operand.vmem [shape: f32[29,27], index: 1, kind: input, shape index: {}]   ;;  %s930_s2 = inlined_call_operand.vmem [shape: f32[32,1], index: 2, kind: input, shape index: {}]   ;;  %s931_s3 = inlined_call_operand.vmem [shape: f32[32,1], index: 3, kind: input, shape index: {}]   ;;  %s932_s4 = inlined_call_operand.vmem [shape: f32[2,32,256], index: 4, kind: output, shape index: {}]  }
   0x1   :  { %s777_s17 = smov 0   ;;  %s779_s18 = smov 0  }
   0x2   :  { %s781_s19 = smov 0   ;;  %s783_s20 = smov 0  }
   0x3   :  { %s785_s21 = smov 0  }
   0x4 LB: > { %s23_s22 = sadd.s32 1, %s737_s19  ;;  %s26_s23 = sadd.s32 1, %s741_s20  ;;  %s745_s21 = sphi %s785_s21, %s14_s21   ;;  %s741_s20 = sphi %s783_s20, %s939_s20   ;;  %s737_s19 = sphi %s781_s19, %s938_s19   ;;  %s733_s18 = sphi %s779_s18, %s937_s18   ;;  %s729_s17 = sphi %s777_s17, %s936_s17   ;;  %s725_s16 = sphi %s775_s16, %s935_s16   ;;  %s721_s15 = sphi %s773_s15, %s934_s15  }
   0x5   : > { %p24_p0 = scmp.ge.s32.totalorder %s23_s22, 2  ;;  %s582_s24 = sadd.s32 4294967295, %s745_s21  }
   0x6   : > { %p42_p1 = scmp.ne.s32.totalorder %s725_s16, %s721_s15  ;;  %p43_p2 = scmp.eq.s32.totalorder %s745_s21, 0 }
   0x7   : > { %s941_s22 = smov (%p24_p0, %s23_s22), 0  ;;  %s943_s23 = smov (!%p24_p0, %s26_s23), %s741_s20 }
   0x8   : > { %p28_p3 = scmp.ge.s32.totalorder %s943_s23, 2  ;;  %p137_p4 = scmp.eq.s32.totalorder %s582_s24, 3 }
   0x9   : > { %s31_s25 = ssub.s32 %s737_s19, %s941_s22  ;;  %p44_p5 = por %p43_p2, %p42_p1 }
   0xa   : > { %s945_s23 = smov (%p28_p3, %s943_s23), 0  ;;  %p821_p6 = por %p137_p4, %p42_p1 }
   0xb   : > { %s30_s27 = ssub.s32 %s741_s20, %s945_s23  ;;  %s35_s29 = sadd.s32 1, %s725_s16 }
   0xc   : > { %s32_s28 = sor.u32 %s31_s25, %s30_s27  ;;  %p585_p8 = scmp.ge.s32.totalorder %s745_s21, 4 }
   0xd   : > { %p33_p7 = scmp.eq.s32.totalorder %s32_s28, 0 }
   0xe   : > { %168 = sbr.rel (%p585_p8) target bundleno = 27 (0x1b), region = 28 }
   0xf   : > { %s829_s30 = scalar_select %p33_p7, %s725_s16, %s35_s29  }
  0x13   : > { %171 = sbr.rel (!%p44_p5) target bundleno = 27 (0x1b), region = 32  ;;  %s173_s5 = sand.u32 (%p44_p5), 1, %s725_s16  }
  0x14   : > { %s587_s6 = sshll.u32 (%p44_p5), %s741_s20, 3  ;;  %s586_s7 = sshll.u32 (%p44_p5), %s173_s5, 5 }
  0x15   : > { %s177_s8 = sadd.s32 (%p44_p5), %s737_s19, %s587_s6  ;;  %s175_s13 = scalar_lea.vmem (%p44_p5), [#allocation2], %s586_s7 }
  0x16   : > { %s588_s9 = sshll.u32 (%p44_p5), %s177_s8, 3 }
  0x17   : > { %s179_s12 = scalar_lea.vmem (%p44_p5), %s928_s0, %s588_s9 }
  0x18   : > { %v214_v0 = vld [vmem:[%s179_s12] sm:$0xff]  ;;  %v216_v1 = vld [vmem:[%s179_s12 + $0x10] sm:$0xff] }
  0x19   : > { %v218_v2 = vld [vmem:[%s179_s12 + $0x20] sm:$0xff]  ;;  %215 = vst [vmem:[%s175_s13] sm:$0xff] %v214_v0  ;;  %217 = vst [vmem:[%s175_s13 + $0x8] sm:$0xff] %v216_v1  ;;  %v220_v3 = vld [vmem:[%s179_s12 + $0x30] sm:$0xff] }
  0x1a   : > { %219 = vst [vmem:[%s175_s13 + $0x10] sm:$0xff] %v218_v2  ;;  %221 = vst [vmem:[%s175_s13 + $0x18] sm:$0xff] %v220_v3 }
  0x1b PF: > { %p589_p9 = scmp.ge.s32.totalorder %s745_s21, 1  ;;  %p226_p10 = scmp.lt.s32.totalorder %s745_s21, 5 }
  0x1d   : > { %p227_p11 = pnand %p589_p9, %p226_p10 }
  0x1e   : > { %s233_s14 = sand.u32 (!%p227_p11), 1, %s721_s15  }
  0x1f   : > { %230 = sbr.rel (%p227_p11) target bundleno = 258 (0x102), region = 70  ;;  %s847_s29 = sshll.u32 (!%p227_p11), %s233_s14, 5 }
  0x20   : > { %s235_s8 = scalar_lea.vmem (!%p227_p11), [#allocation2], %s847_s29  ;;  %s889_s10 = scalar_lea.vmem (!%p227_p11), [#allocation3], %s847_s29 }
  0x24   : > { %v261_v4 = vld [vmem:[%s929_s1] sm:$0xff]  ;;  %vm265_vm0 = vcmask 220160   ;;  %v263_v5 = vld [vmem:[%s929_s1 + $0x10] sm:$0xff]  ;;  %vm278_vm1 = vcmask 1042432   ;;  %v385_v6 = vld [vmem:[%s930_s2 + $0x18] sm:$0xff]  ;;  %v747_v8 = vmov 0  }
  0x25   : > { %618 = vmatprep.mubr.msk.f32.mxu0 %vm265_vm0, %v261_v4  ;;  %621 = vmatprep.mubr.msk.f32.mxu1 %vm265_vm0, %v263_v5  ;;  %v383_v7 = vld [vmem:[%s930_s2 + $0x8] sm:$0xff]  ;;  %v260_v9 = vld [vmem:[%s235_s8 + $0x18] sm:$0x7]  ;;  %v259_v10 = vld [vmem:[%s235_s8 + $0x10] sm:$0xff]  ;;  %vm369_vm2 = vcmask 1044480   ;;  %s598_s29 = sshll.u32 (%p821_p6), %s733_s18, 3 }
  0x26   : > { %690 = vset.pattern.permute.xlu1 %v747_v8  ;;  %689 = vset.pattern.permute.xlu0 %v747_v8  ;;  %v258_v11 = vld [vmem:[%s235_s8 + $0x8] sm:$0xff]  ;;  %v371_v13 = vrot.slane %v259_v10, 3  ;;  %v375_v14 = vrot.slane %v260_v9, 3  ;;  %v257_v17 = vld [vmem:[%s235_s8] sm:$0xff]  ;;  %v264_v21 = vld [vmem:[%s929_s1 + $0x18] sm:$0x1f]  ;;  %s462_s11 = sadd.s32 (%p821_p6), %s729_s17, %s598_s29 }
  0x27   : > { %407 = vperm.xlu0 %689, %v385_v6   ;;  %397 = vperm.xlu1 %690, %v383_v7   ;;  %v370_v12 = vrot.slane %v258_v11, 3  ;;  %v262_v20 = vld [vmem:[%s929_s1 + $0x8] sm:$0xff]  ;;  %v384_v22 = vld [vmem:[%s930_s2 + $0x10] sm:$0xff]  ;;  %v382_v23 = vld [vmem:[%s930_s2] sm:$0xff]  ;;  %s599_s12 = sshll.u32 (%p821_p6), %s462_s11, 3 }
  0x28   : > { %610 = vmatprep.subr.msk.mxu0 %vm278_vm1, %v260_v9  ;;  %624 = vmatprep.subr.msk.mxu1 %vm278_vm1, %v260_v9  ;;  %v377_v16 = vmax.f32 %v259_v10, %v375_v14  ;;  %v386_v25 = vld [vmem:[%s931_s3] sm:$0xff]  ;;  %v389_v26 = vld [vmem:[%s931_s3 + $0x18] sm:$0xff]  ;;  %v388_v27 = vld [vmem:[%s931_s3 + $0x10] sm:$0xff]  ;;  %s464_s24 = scalar_lea.vmem (%p821_p6), %s932_s4, %s599_s12 }
  0x29   : > { %611 = vmatpush3.msk.msra.mxu0 %vm278_vm1, %v260_v9  ;;  %628 = vmatpush3.msk.msra.mxu1 %vm278_vm1, %v260_v9  ;;  %v372_v15 = vsel %vm369_vm2, %v370_v12, %v371_v13  ;;  %v387_v28 = vld [vmem:[%s931_s3 + $0x8] sm:$0xff] }
  0x2a   : > { %612 = vmatprep.subr.mxu0 %v259_v10  ;;  %625 = vmatprep.subr.mxu1 %v259_v10  ;;  %v374_v18 = vmax.f32 %v258_v11, %v372_v15  ;;  %v379_v19 = vrot.slane %v377_v16, 1 }
  0x2b   : > { %613 = vmatpush3.msra.mxu0 %v259_v10  ;;  %629 = vmatpush3.msra.mxu1 %v259_v10 }
  0x2c   : > { %614 = vmatprep.subr.mxu0 %v258_v11  ;;  %626 = vmatprep.subr.mxu1 %v258_v11  ;;  %v381_v24 = vmax.f32 %v374_v18, %v379_v19 }
  0x2d   : > { %615 = vmatpush3.msra.mxu0 %v258_v11  ;;  %630 = vmatpush3.msra.mxu1 %v258_v11 }
  0x2e   : > { %616 = vmatprep.subr.mxu0 %v257_v17  ;;  %627 = vmatprep.subr.mxu1 %v257_v17 }
  0x2f   : > { %617 = vmatpush3.msra.mxu0 %v257_v17  ;;  %631 = vmatpush3.msra.mxu1 %v257_v17 }
  0x30   : > { %619 = vmatmul.mubr.msk.f32.vlgmr.msra.gmra.mxu0 %vm265_vm0, %v262_v20  ;;  %622 = vmatmul.mubr.msk.f32.vlgmr.msra.gmra.mxu1 %vm265_vm0, %v264_v21 }
  0x31   : > { %402 = vperm.xlu1 %690, %v384_v22   ;;  %392 = vperm.xlu0 %689, %v382_v23  }
  0x35   : > { %416 = vperm.xlu1 %690, %v386_v25   ;;  %431 = vperm.xlu0 %689, %v389_v26  }
  0x39   : > { %426 = vperm.xlu1 %690, %v388_v27   ;;  %421 = vperm.xlu0 %689, %v387_v28  }
  0xa2   : > { %v408_v29 = vpop.permute.xlu0 %407  ;;  %v398_v37 = vpop.permute.xlu1 %397 }
  0xa3   : > { %v446_v30 = vrot.slane %v408_v29, 1 }
  0xa5   : > { %v448_v32 = vmul.f32 %v446_v30, %v381_v24 }
  0xac   : > { %v393_v31 = vpop.permute.xlu0 %392  ;;  %v403_v38 = vpop.permute.xlu1 %402 }
  0xb0   : > { %v432_v33 = vpop.permute.xlu0 %431  ;;  %v417_v39 = vpop.permute.xlu1 %416 }
  0xb1   : > { %v449_v34 = vrot.slane %v432_v33, 1 }
  0xb3   : > { %v451_v35 = vadd.f32 %v449_v34, %v448_v32 }
  0xb4   : > { %v422_v42 = vpop.permute.xlu0 %421  ;;  %v427_v51 = vpop.permute.xlu1 %426 }
  0xb5   : > { %v452_v36 = vmax.f32 %v451_v35, 0.0 }
  0xb7   : > { %453 = vst [vmem:[%s889_s10 + $0x19] sm:$0x70] %v452_v36 }
  0xf0   : > { %v620_v40 = vpop.f32.mrf.mxu0  ;;  %v623_v41 = vpop.f32.mrf.mxu1 }
  0xf1   : > { %v411_v43 = vmul.f32 %v620_v40, %v398_v37  ;;  %v413_v44 = vmul.f32 %v623_v41, %v408_v29 }
  0xf2   : > { %v348_v45 = vpop.f32.mrf.mxu0  ;;  %v358_v46 = vpop.f32.mrf.mxu1 }
  0xf3   : > { %v435_v47 = vadd.f32 %v422_v42, %v411_v43  ;;  %v437_v48 = vadd.f32 %v432_v33, %v413_v44  ;;  %v410_v49 = vmul.f32 %v393_v31, %v348_v45  ;;  %v412_v50 = vmul.f32 %v403_v38, %v358_v46 }
  0xf5   : > { %v439_v52 = vmax.f32 %v435_v47, 0.0  ;;  %v441_v53 = vmax.f32 %v437_v48, 0.0  ;;  %v434_v54 = vadd.f32 %v417_v39, %v410_v49  ;;  %v436_v55 = vadd.f32 %v427_v51, %v412_v50  ;;  %460 = sbr.rel (!%p821_p6) target bundleno = 258 (0x102), region = 78 }
  0xf7   : > { %443 = vst [vmem:[%s889_s10 + $0x8] sm:$0xff] %v439_v52  ;;  %445 = vst [vmem:[%s889_s10 + $0x18] sm:$0x1f] %v441_v53  ;;  %v438_v56 = vmax.f32 %v434_v54, 0.0  ;;  %v440_v57 = vmax.f32 %v436_v55, 0.0 }
  0xf9   : > { %442 = vst [vmem:[%s889_s10] sm:$0xff] %v438_v56  ;;  %444 = vst [vmem:[%s889_s10 + $0x10] sm:$0xff] %v440_v57 }
  0xfe   : > { %v501_v59 = vld [vmem:[%s889_s10 + $0x8] sm:$0xff]  ;;  %v505_v61 = vld [vmem:[%s889_s10 + $0x18] sm:$0xff] }
  0xff   : > { %502 = vst [vmem:[%s464_s24 + $0x10] sm:$0xff] %v501_v59  ;;  %506 = vst [vmem:[%s464_s24 + $0x30] sm:$0xff] %v505_v61 }
 0x100   : > { %v499_v58 = vld [vmem:[%s889_s10] sm:$0xff]  ;;  %v503_v60 = vld [vmem:[%s889_s10 + $0x10] sm:$0xff] }
 0x101   : > { %500 = vst [vmem:[%s464_s24] sm:$0xff] %v499_v58  ;;  %504 = vst [vmem:[%s464_s24 + $0x20] sm:$0xff] %v503_v60 }
 0x102 PF: > { %s14_s21 = sadd.s32 1, %s745_s21   ;;  %s934_s15 = smov %s725_s16 }
 0x103   : > { %p11_p12 = scmp.ge.s32.totalorder %s14_s21, 6   ;;  %s935_s16 = smov %s829_s30 }
 0x104   : > { %s936_s17 = smov %s737_s19  ;;  %s937_s18 = smov %s741_s20 }
 0x105   : > { %s938_s19 = smov %s941_s22  ;;  %s939_s20 = smov %s945_s23 }
 0x106   :  { %13 = sbr.rel (!%p11_p12) target bundleno = 4 (0x4), region = 147 }

// kernel: _downsampler_block_impl.2
= control target key start
LH: loop header
LB: loop body
LE: loop exit
PB: predicated region body
PF: predicated region fallthrough
CT: control target
= control target key end

     0   :  { %s1421_s18 = smov 0   ;;  %s1423_s19 = smov 0   ;;  %s1721_s0 = inlined_call_operand.vmem [shape: f32[2,27,256], index: 0, kind: input, shape index: {}]   ;;  %s1722_s1 = inlined_call_operand.vmem [shape: f32[29,27], index: 1, kind: input, shape index: {}]   ;;  %s1723_s2 = inlined_call_operand.vmem [shape: f32[2,29,1], index: 2, kind: output, shape index: {0}]   ;;  %s1724_s3 = inlined_call_operand.vmem [shape: f32[2,29,1], index: 3, kind: output, shape index: {1}]   ;;  %s1725_s4 = inlined_call_operand.vmem [shape: f32[2,3,1], index: 4, kind: output, shape index: {2}]   ;;  %s1726_s5 = inlined_call_operand.vmem [shape: f32[2,3,1], index: 5, kind: output, shape index: {3}]  }
   0x1   :  { %s1425_s20 = smov 0   ;;  %s1427_s21 = smov 0  }
   0x2   :  { %s1429_s22 = smov 0   ;;  %s1431_s23 = smov 0  }
   0x3   :  { %s1433_s24 = smov 0  }
   0x4 LB: > { %s31_s25 = sadd.s32 1, %s1377_s22  ;;  %s35_s26 = sadd.s32 1, %s1381_s23  ;;  %s1385_s24 = sphi %s1433_s24, %s16_s24   ;;  %s1381_s23 = sphi %s1431_s23, %s1732_s23   ;;  %s1377_s22 = sphi %s1429_s22, %s1731_s22   ;;  %s1373_s21 = sphi %s1427_s21, %s1730_s21   ;;  %s1369_s20 = sphi %s1425_s20, %s1729_s20   ;;  %s1365_s19 = sphi %s1423_s19, %s1728_s19   ;;  %s1361_s18 = sphi %s1421_s18, %s1727_s18  }
   0x5   : > { %p33_p0 = scmp.ge.s32.totalorder %s31_s25, 2  ;;  %p53_p1 = scmp.ne.s32.totalorder %s1365_s19, %s1361_s18 }
   0x6   : > { %p54_p2 = scmp.eq.s32.totalorder %s1385_s24, 0  ;;  %s46_s30 = sadd.s32 1, %s1365_s19 }
   0x7   : > { %s1734_s25 = smov (%p33_p0, %s31_s25), 0  ;;  %s1736_s26 = smov (!%p33_p0, %s35_s26), %s1381_s23 }
   0x8   : > { %p55_p3 = por %p54_p2, %p53_p1  ;;  %p37_p4 = scmp.ge.s32.totalorder %s1736_s26, 2 }
   0x9   : > { %s41_s27 = ssub.s32 %s1377_s22, %s1734_s25  ;;  %p1006_p6 = scmp.ge.s32.totalorder %s1385_s24, 4 }
   0xa   : > { %s1738_s26 = smov (%p37_p4, %s1736_s26), 0 }
   0xb   : > { %s42_s28 = ssub.s32 %s1381_s23, %s1738_s26  ;;  %207 = sbr.rel (%p1006_p6) target bundleno = 24 (0x18), region = 20 }
   0xc   : > { %s43_s29 = sor.u32 %s42_s28, %s41_s27 }
   0xd   : > { %p44_p5 = scmp.eq.s32.totalorder %s43_s29, 0 }
   0xf   : > { %s1472_s6 = scalar_select %p44_p5, %s1365_s19, %s46_s30  }
  0x10   : > { %210 = sbr.rel (!%p55_p3) target bundleno = 24 (0x18), region = 24  ;;  %s212_s7 = sand.u32 (%p55_p3), 1, %s1365_s19  }
  0x11   : > { %s1008_s8 = sshll.u32 (%p55_p3), %s1377_s22, 3  ;;  %s1007_s9 = sshll.u32 (%p55_p3), %s212_s7, 5 }
  0x12   : > { %s217_s10 = sadd.s32 (%p55_p3), %s1381_s23, %s1008_s8  ;;  %s214_s15 = scalar_lea.vmem (%p55_p3), [#allocation2], %s1007_s9 }
  0x13   : > { %s1009_s11 = sshll.u32 (%p55_p3), %s217_s10, 3 }
  0x14   : > { %s219_s14 = scalar_lea.vmem (%p55_p3), %s1721_s0, %s1009_s11 }
  0x15   : > { %v254_v0 = vld [vmem:[%s219_s14] sm:$0xff]  ;;  %v256_v1 = vld [vmem:[%s219_s14 + $0x10] sm:$0xff] }
  0x16   : > { %v258_v2 = vld [vmem:[%s219_s14 + $0x20] sm:$0xff]  ;;  %255 = vst [vmem:[%s214_s15] sm:$0xff] %v254_v0  ;;  %257 = vst [vmem:[%s214_s15 + $0x8] sm:$0xff] %v256_v1  ;;  %v260_v3 = vld [vmem:[%s219_s14 + $0x30] sm:$0xff] }
  0x17   : > { %259 = vst [vmem:[%s214_s15 + $0x10] sm:$0xff] %v258_v2  ;;  %261 = vst [vmem:[%s214_s15 + $0x18] sm:$0xff] %v260_v3 }
  0x18 PF: > { %p1010_p7 = scmp.ge.s32.totalorder %s1385_s24, 1  ;;  %p266_p8 = scmp.lt.s32.totalorder %s1385_s24, 5 }
  0x1a   : > { %p267_p9 = pnand %p1010_p7, %p266_p8 }
  0x1b   : > { %s273_s16 = sand.u32 (!%p267_p9), 1, %s1361_s18   ;;  %p314_p10 = scmp.lt.s32.totalorder (!%p267_p9), %s1373_s21, 1 }
  0x1c   : > { %270 = sbr.rel (%p267_p9) target bundleno = 479 (0x1df), region = 62  ;;  %s1011_s17 = sshll.u32 (!%p267_p9), %s273_s16, 5 }
  0x1d   : > { %p332_p11 = scmp.eq.s32.totalorder (!%p267_p9), %s1369_s20, 0 }
  0x21   : > { %s1740_s21 = smov (!%p314_p10, %s1373_s21), 1  ;;  %337 = sbr.rel (!%p332_p11) target bundleno = 41 (0x29), region = 70  ;;  %vm338_vm0 = vcmask (%p332_p11), 7168   ;;  %vm342_vm1 = vcmask (%p332_p11), 4096   ;;  %vm348_vm2 = vcmask (%p332_p11), 2048   ;;  %v1387_v4 = vmov (%p332_p11), 0.0  }
  0x22   : > { %s1026_s27 = sshll.u32 %s1740_s21, 5  ;;  %s1016_s28 = sshll.u32 %s1740_s21, 2 }
  0x23   : > { %s1490_s7 = scalar_lea.vmem %s1723_s2, %s1026_s27  ;;  %s1495_s10 = scalar_lea.vmem %s1724_s3, %s1026_s27 }
  0x24   : > { %s1500_s18 = scalar_lea.vmem %s1725_s4, %s1016_s28  ;;  %s1505_s14 = scalar_lea.vmem %s1726_s5, %s1016_s28  ;;  %339 = vst.msk [vmem:[%s1490_s7] sm:$0xff] (%p332_p11), %vm338_vm0, %v1387_v4  ;;  %340 = vst.msk [vmem:[%s1490_s7 + $0x8] sm:$0xff] (%p332_p11), %vm338_vm0, %v1387_v4 }
  0x25   : > { %s1507_s21 = scalar_lea.vmem [#allocation2], %s1011_s17  ;;  %341 = vst.msk [vmem:[%s1490_s7 + $0x10] sm:$0xff] (%p332_p11), %vm338_vm0, %v1387_v4  ;;  %344 = vst.msk [vmem:[%s1495_s10] sm:$0xff] (%p332_p11), %vm338_vm0, %v1387_v4 }
  0x26   : > { %345 = vst.msk [vmem:[%s1495_s10 + $0x8] sm:$0xff] %vm338_vm0, %v1387_v4  ;;  %346 = vst.msk [vmem:[%s1495_s10 + $0x10] sm:$0xff] %vm338_vm0, %v1387_v4 }
  0x27   : > { %343 = vst.msk [vmem:[%s1490_s7 + $0x18] sm:$0x1f] %vm342_vm1, %v1387_v4  ;;  %347 = vst.msk [vmem:[%s1495_s10 + $0x18] sm:$0x1f] %vm342_vm1, %v1387_v4 }
  0x28   : > { %349 = vst.msk [vmem:[%s1500_s18] sm:$0x7] %vm348_vm2, %v1387_v4  ;;  %350 = vst.msk [vmem:[%s1505_s14] sm:$0x7] %vm348_vm2, %v1387_v4 }
  0x29 PF: > { %v354_v5 = vld [vmem:[%s1507_s21 + $0x18] sm:$0x7]  ;;  %vm372_vm3 = vcmask 1042432   ;;  %v353_v6 = vld [vmem:[%s1507_s21 + $0x10] sm:$0xff]  ;;  %v352_v7 = vld [vmem:[%s1507_s21 + $0x8] sm:$0xff]  ;;  %vm463_vm4 = vcmask 1044480  }
  0x2a   : > { %1111 = vmatprep.subr.msk.mxu0 %vm372_vm3, %v354_v5  ;;  %v469_v8 = vrot.slane %v354_v5, 3  ;;  %v465_v9 = vrot.slane %v353_v6, 3  ;;  %v464_v10 = vrot.slane %v352_v7, 3  ;;  %v355_v11 = vld [vmem:[%s1722_s1] sm:$0xff]  ;;  %vm359_vm5 = vcmask 220160   ;;  %v356_v18 = vld [vmem:[%s1722_s1 + $0x8] sm:$0xff] }
  0x2b   : > { %1112 = vmatpush3.msk.msra.mxu0 %vm372_vm3, %v354_v5  ;;  %1119 = vmatprep.mubr.msk.f32.mxu0 %vm359_vm5, %v355_v11  ;;  %v1388_v14 = vmov 1.0   ;;  %v351_v16 = vld [vmem:[%s1507_s21] sm:$0xff]  ;;  %v357_v20 = vld [vmem:[%s1722_s1 + $0x10] sm:$0xff]  ;;  %v358_v21 = vld [vmem:[%s1722_s1 + $0x18] sm:$0x1f]  ;;  %v1389_v22 = vmov 0.0  }
  0x2c   : > { %1113 = vmatprep.subr.mxu0 %v353_v6  ;;  %v471_v12 = vmax.f32 %v353_v6, %v469_v8  ;;  %v466_v13 = vsel %vm463_vm4, %v464_v10, %v465_v9  ;;  %1125 = vmatprep.subr.mxu1 %v1388_v14  ;;  %vm1390_vm6 = vmmov 0   ;;  %vm569_vm7 = vcmask 7168  }
  0x2d   : > { %1114 = vmatpush3.msra.mxu0 %v353_v6  ;;  %v468_v15 = vmax.f32 %v352_v7, %v466_v13  ;;  %1126 = vmatpush3.msra.mxu1 %v1388_v14  ;;  %vm573_vm8 = vcmask 4096   ;;  %vm751_vm9 = vcmask 2048  }
  0x2e   : > { %v473_v17 = vrot.slane %v471_v12, 1  ;;  %1115 = vmatprep.subr.mxu0 %v352_v7  ;;  %1127 = vmatprep.subr.mxu1 %v1388_v14  ;;  %v477_v34 = vld [vmem:[%s1490_s7 + $0x8] sm:$0xff]  ;;  %v476_v36 = vld [vmem:[%s1490_s7] sm:$0xff]  ;;  %v479_v46 = vld [vmem:[%s1490_s7 + $0x18] sm:$0x1f] }
  0x2f   : > { %1116 = vmatpush3.msra.mxu0 %v352_v7  ;;  %1128 = vmatpush3.msra.mxu1 %v1388_v14  ;;  %v575_v41 = vld [vmem:[%s1495_s10] sm:$0xff]  ;;  %v478_v48 = vld [vmem:[%s1490_s7 + $0x10] sm:$0xff]  ;;  %v578_v50 = vld [vmem:[%s1495_s10 + $0x18] sm:$0x1f] }
  0x30   : > { %v1534_v19 = vmax.f32 %v468_v15, %v473_v17  ;;  %1117 = vmatprep.subr.mxu0 %v351_v16  ;;  %1129 = vmatprep.subr.mxu1 %v1388_v14  ;;  %v576_v37 = vld [vmem:[%s1495_s10 + $0x8] sm:$0xff]  ;;  %v577_v54 = vld [vmem:[%s1495_s10 + $0x10] sm:$0xff]  ;;  %v676_v58 = vld [vmem:[%s1500_s18] sm:$0x7] }
  0x31   : > { %1118 = vmatpush3.msra.mxu0 %v351_v16  ;;  %1130 = vmatpush3.msra.mxu1 %v1388_v14  ;;  %v753_v61 = vld [vmem:[%s1505_s14] sm:$0x7] }
  0x32   : > { %1120 = vmatmul.mubr.msk.f32.vlgmr.msra.gmra.mxu0 %vm359_vm5, %v356_v18  ;;  %1163 = vmatprep.subr.mxu0 %v1388_v14  ;;  %v754_v31 = vmul.f32 %v1534_v19, %v1534_v19  ;;  %v678_v32 = vrot.slane %v1534_v19, 4 }
  0x33   : > { %1122 = vmatprep.mubr.msk.f32.mxu0 %vm359_vm5, %v357_v20  ;;  %1164 = vmatpush3.msra.mxu0 %v1388_v14 }
  0x34   : > { %1165 = vmatprep.subr.mxu0 %v1388_v14  ;;  %1131 = vmatprep.subr.mxu1 %v1388_v14  ;;  %v756_v33 = vrot.slane %v754_v31, 4 }
  0x35   : > { %1166 = vmatpush3.msra.mxu0 %v1388_v14  ;;  %1132 = vmatpush3.msra.mxu1 %v1388_v14 }
  0x36   : > { %1123 = vmatmul.mubr.msk.f32.gmra.mxu0 %vm359_vm5, %v358_v21  ;;  %1167 = vmatprep.subr.mxu0 %v1388_v14 }
  0x37   : > { %1168 = vmatpush3.msra.mxu0 %v1388_v14  ;;  %1133 = vmatprep.subr.mxu1 %v1388_v14 }
  0x38   : > { %1169 = vmatprep.subr.mxu0 %v1388_v14  ;;  %1134 = vmatpush3.msra.mxu1 %v1388_v14 }
  0x39   : > { %1170 = vmatpush3.msra.mxu0 %v1388_v14  ;;  %1135 = vmatprep.subr.mxu1 %v1388_v14 }
  0x3a   : > { %1171 = vmatprep.subr.mxu0 %v1388_v14  ;;  %1136 = vmatpush3.msra.mxu1 %v1388_v14 }
  0x3b   : > { %1172 = vmatpush3.msra.mxu0 %v1388_v14  ;;  %1137 = vmatprep.subr.mxu1 %v1388_v14 }
  0x3c   : > { %1173 = vmatprep.subr.mxu0 %v1388_v14  ;;  %1138 = vmatpush3.msra.mxu1 %v1388_v14 }
  0x3d   : > { %1174 = vmatpush3.msra.mxu0 %v1388_v14  ;;  %1139 = vmatprep.subr.mxu1 %v1388_v14 }
  0x3e   : > { %1175 = vmatprep.subr.mxu0 %v1388_v14  ;;  %1140 = vmatpush3.msra.mxu1 %v1388_v14 }
  0x3f   : > { %1176 = vmatpush3.msra.mxu0 %v1388_v14  ;;  %1141 = vmatprep.subr.mxu1 %v1388_v14 }
  0x40   : > { %1177 = vmatprep.subr.mxu0 %v1388_v14  ;;  %1142 = vmatpush3.msra.mxu1 %v1388_v14 }
  0x41   : > { %1178 = vmatpush3.msra.mxu0 %v1388_v14  ;;  %1143 = vmatprep.subr.mxu1 %v1388_v14 }
  0x42   : > { %1179 = vmatprep.subr.mxu0 %v1388_v14  ;;  %1144 = vmatpush3.msra.mxu1 %v1388_v14 }
  0x43   : > { %1180 = vmatpush3.msra.mxu0 %v1388_v14  ;;  %1145 = vmatprep.subr.mxu1 %v1388_v14 }
  0x44   : > { %1181 = vmatprep.subr.mxu0 %v1388_v14  ;;  %1146 = vmatpush3.msra.mxu1 %v1388_v14 }
  0x45   : > { %1182 = vmatpush3.msra.mxu0 %v1388_v14  ;;  %1147 = vmatprep.subr.mxu1 %v1388_v14 }
  0x46   : > { %1183 = vmatprep.subr.mxu0 %v1388_v14  ;;  %1148 = vmatpush3.msra.mxu1 %v1388_v14 }
  0x47   : > { %1184 = vmatpush3.msra.mxu0 %v1388_v14  ;;  %1149 = vmatprep.subr.mxu1 %v1388_v14 }
  0x48   : > { %1185 = vmatprep.subr.mxu0 %v1388_v14  ;;  %1150 = vmatpush3.msra.mxu1 %v1388_v14 }
  0x49   : > { %1186 = vmatpush3.msra.mxu0 %v1388_v14  ;;  %1151 = vmatprep.subr.mxu1 %v1388_v14 }
  0x4a   : > { %1187 = vmatprep.subr.mxu0 %v1388_v14  ;;  %1152 = vmatpush3.msra.mxu1 %v1388_v14 }
  0x4b   : > { %1188 = vmatpush3.msra.mxu0 %v1388_v14  ;;  %1153 = vmatprep.subr.mxu1 %v1388_v14 }
  0x4c   : > { %1189 = vmatprep.subr.mxu0 %v1388_v14  ;;  %1154 = vmatpush3.msra.mxu1 %v1388_v14 }
  0x4d   : > { %1190 = vmatpush3.msra.mxu0 %v1388_v14  ;;  %1155 = vmatprep.subr.mxu1 %v1388_v14 }
  0x4e   : > { %1191 = vmatprep.subr.mxu0 %v1388_v14  ;;  %1156 = vmatpush3.msra.mxu1 %v1388_v14 }
  0x4f   : > { %1192 = vmatpush3.msra.mxu0 %v1388_v14  ;;  %1201 = vmatprep.subr.mxu1 %v1389_v22 }
  0x50   : > { %1193 = vmatprep.subr.mxu0 %v1388_v14 }
  0x51   : > { %1194 = vmatpush3.msra.mxu0 %v1388_v14 }
  0x52   : > { %1236 = vmatprep.subr.mxu0 %v1389_v22 }
  0xf2   : > { %v1121_v23 = vpop.f32.mrf.mxu0 }
  0xf3   : > { %v580_v26 = vmul.f32 %v1121_v23, %v1121_v23 }
  0xf4   : > { %v442_v24 = vpop.f32.mrf.mxu0 }
  0xf5   : > { %v579_v25 = vmul.f32 %v442_v24, %v442_v24  ;;  %1157 = vmatprep.mubr.f32.mxu1 %v442_v24 }
  0xf6   : > { %1158 = vmatmul.mubr.f32.vlgmr.msra.gmra.mxu1 %v1121_v23  ;;  %v1124_v27 = vpop.f32.mrf.mxu0 }
  0xf7   : > { %1202 = vmatpush3.msra.mxu1 %v1388_v14  ;;  %1195 = vmatprep.mubr.f32.mxu0 %v579_v25  ;;  %v582_v30 = vmul.f32 %v1124_v27, %v1124_v27 }
  0xf8   : > { %1203 = vmatprep.subr.mxu1 %v1389_v22  ;;  %1196 = vmatmul.mubr.f32.vlgmr.msra.gmra.mxu0 %v580_v26  ;;  %v452_v28 = vpop.f32.mrf.mxu0 }
  0xf9   : > { %1204 = vmatpush3.msra.mxu1 %v1388_v14  ;;  %1237 = vmatpush3.msra.mxu0 %v1388_v14  ;;  %v581_v29 = vmul.f32 %v452_v28, %v452_v28 }
  0xfa   : > { %1205 = vmatprep.subr.mxu1 %v1389_v22  ;;  %1238 = vmatprep.subr.mxu0 %v1389_v22 }
  0xfb   : > { %1206 = vmatpush3.msra.mxu1 %v1388_v14  ;;  %1239 = vmatpush3.msra.mxu0 %v1388_v14 }
  0xfc   : > { %1207 = vmatprep.subr.mxu1 %v1389_v22  ;;  %1240 = vmatprep.subr.mxu0 %v1389_v22 }
  0xfd   : > { %1208 = vmatpush3.msra.mxu1 %v1388_v14  ;;  %1241 = vmatpush3.msra.mxu0 %v1388_v14 }
  0xfe   : > { %1209 = vmatprep.subr.mxu1 %v1389_v22  ;;  %1242 = vmatprep.subr.mxu0 %v1389_v22 }
  0xff   : > { %1210 = vmatpush3.msra.mxu1 %v1388_v14  ;;  %1243 = vmatpush3.msra.mxu0 %v1388_v14 }
 0x100   : > { %1211 = vmatprep.subr.mxu1 %v1389_v22  ;;  %1244 = vmatprep.subr.mxu0 %v1389_v22 }
 0x101   : > { %1212 = vmatpush3.msra.mxu1 %v1388_v14  ;;  %1245 = vmatpush3.msra.mxu0 %v1388_v14 }
 0x102   : > { %1213 = vmatprep.subr.mxu1 %v1389_v22  ;;  %1246 = vmatprep.subr.mxu0 %v1389_v22 }
 0x103   : > { %1214 = vmatpush3.msra.mxu1 %v1388_v14  ;;  %1247 = vmatpush3.msra.mxu0 %v1388_v14 }
 0x104   : > { %1215 = vmatprep.subr.mxu1 %v1389_v22  ;;  %1248 = vmatprep.subr.mxu0 %v1389_v22 }
 0x105   : > { %1216 = vmatpush3.msra.mxu1 %v1388_v14  ;;  %1249 = vmatpush3.msra.mxu0 %v1388_v14 }
 0x106   : > { %1217 = vmatprep.subr.mxu1 %v1389_v22  ;;  %1250 = vmatprep.subr.mxu0 %v1389_v22 }
 0x107   : > { %1218 = vmatpush3.msra.mxu1 %v1388_v14  ;;  %1251 = vmatpush3.msra.mxu0 %v1388_v14 }
 0x108   : > { %1219 = vmatprep.subr.mxu1 %v1389_v22  ;;  %1252 = vmatprep.subr.mxu0 %v1389_v22 }
 0x109   : > { %1220 = vmatpush3.msra.mxu1 %v1388_v14  ;;  %1253 = vmatpush3.msra.mxu0 %v1388_v14 }
 0x10a   : > { %1221 = vmatprep.subr.mxu1 %v1389_v22  ;;  %1254 = vmatprep.subr.mxu0 %v1389_v22 }
 0x10b   : > { %1222 = vmatpush3.msra.mxu1 %v1388_v14  ;;  %1255 = vmatpush3.msra.mxu0 %v1388_v14 }
 0x10c   : > { %1160 = vmatprep.mubr.f32.mxu1 %v452_v28  ;;  %1223 = vmatprep.subr.mxu1 %v1389_v22 }
 0x10d   : > { %1256 = vmatprep.subr.mxu0 %v1389_v22  ;;  %1161 = vmatmul.mubr.f32.gmra.mxu1 %v1124_v27 }
 0x10e   : > { %1224 = vmatpush3.msra.mxu1 %v1388_v14  ;;  %1257 = vmatpush3.msra.mxu0 %v1388_v14 }
 0x10f   : > { %1198 = vmatprep.mubr.f32.mxu0 %v581_v29  ;;  %1225 = vmatprep.subr.mxu1 %v1389_v22 }
 0x110   : > { %1258 = vmatprep.subr.mxu0 %v1389_v22  ;;  %1199 = vmatmul.mubr.f32.gmra.mxu0 %v582_v30 }
 0x111   : > { %1226 = vmatpush3.msra.mxu1 %v1388_v14  ;;  %1259 = vmatpush3.msra.mxu0 %v1388_v14 }
 0x112   : > { %1227 = vmatprep.subr.mxu1 %v1389_v22  ;;  %1260 = vmatprep.subr.mxu0 %v1389_v22 }
 0x113   : > { %1228 = vmatpush3.msra.mxu1 %v1388_v14  ;;  %1261 = vmatpush3.msra.mxu0 %v1388_v14 }
 0x114   : > { %1229 = vmatprep.subr.mxu1 %v1389_v22  ;;  %1262 = vmatprep.subr.mxu0 %v1389_v22 }
 0x115   : > { %1230 = vmatpush3.msra.mxu1 %v1388_v14  ;;  %1263 = vmatpush3.msra.mxu0 %v1388_v14 }
 0x116   : > { %1231 = vmatprep.subr.mxu1 %v1389_v22  ;;  %1264 = vmatprep.subr.mxu0 %v1389_v22 }
 0x117   : > { %1232 = vmatpush3.msra.mxu1 %v1388_v14  ;;  %1233 = vmatprep.mubr.msk.f32.mxu1 %vm1390_vm6, %v1389_v22 }
 0x118   : > { %1265 = vmatpush3.msra.mxu0 %v1388_v14  ;;  %1234 = vmatmul.mubr.f32.vlgmr.msra.gmra.mxu1 %v678_v32 }
 0x119   : > { %1266 = vmatprep.subr.mxu0 %v1389_v22  ;;  %1268 = vmatprep.mubr.msk.f32.mxu0 %vm1390_vm6, %v1389_v22 }
 0x11a   : > { %1267 = vmatpush3.msra.mxu0 %v1388_v14 }
 0x11b   : > { %1269 = vmatmul.mubr.f32.vlgmr.msra.gmra.mxu0 %v756_v33 }
 0x1b6   : > { %v1159_v35 = vpop.f32.mrf.mxu1 }
 0x1b7   : > { %v566_v38 = vadd.f32 %v1159_v35, %v477_v34 }
 0x1b8   : > { %v546_v39 = vpop.f32.mrf.mxu1  ;;  %v1197_v40 = vpop.f32.mrf.mxu0 }
 0x1b9   : > { %571 = vst.msk [vmem:[%s1490_s7 + $0x8] sm:$0xff] %vm569_vm7, %v566_v38  ;;  %v565_v42 = vadd.f32 %v546_v39, %v476_v36  ;;  %v669_v43 = vadd.f32 %v1197_v40, %v576_v37 }
 0x1ba   : > { %v649_v44 = vpop.f32.mrf.mxu0 }
 0x1bb   : > { %570 = vst.msk [vmem:[%s1490_s7] sm:$0xff] %vm569_vm7, %v565_v42  ;;  %673 = vst.msk [vmem:[%s1495_s10 + $0x8] sm:$0xff] %vm569_vm7, %v669_v43  ;;  %v668_v45 = vadd.f32 %v649_v44, %v575_v41 }
 0x1bd   : > { %672 = vst.msk [vmem:[%s1495_s10] sm:$0xff] %vm569_vm7, %v668_v45 }
 0x1cd   : > { %v1162_v47 = vpop.f32.mrf.mxu1 }
 0x1ce   : > { %v568_v49 = vadd.f32 %v1162_v47, %v479_v46 }
 0x1cf   : > { %v556_v51 = vpop.f32.mrf.mxu1 }
 0x1d0   : > { %574 = vst.msk [vmem:[%s1490_s7 + $0x18] sm:$0x1f] %vm573_vm8, %v568_v49  ;;  %v567_v52 = vadd.f32 %v556_v51, %v478_v48  ;;  %v1200_v53 = vpop.f32.mrf.mxu0 }
 0x1d1   : > { %v671_v55 = vadd.f32 %v1200_v53, %v578_v50 }
 0x1d2   : > { %572 = vst.msk [vmem:[%s1490_s7 + $0x10] sm:$0xff] %vm569_vm7, %v567_v52  ;;  %v659_v56 = vpop.f32.mrf.mxu0 }
 0x1d3   : > { %675 = vst.msk [vmem:[%s1495_s10 + $0x18] sm:$0x1f] %vm573_vm8, %v671_v55  ;;  %v670_v57 = vadd.f32 %v659_v56, %v577_v54 }
 0x1d5   : > { %674 = vst.msk [vmem:[%s1495_s10 + $0x10] sm:$0xff] %vm569_vm7, %v670_v57 }
 0x1d8   : > { %v746_v59 = vpop.f32.mrf.mxu1 }
 0x1d9   : > { %v750_v60 = vadd.f32 %v746_v59, %v676_v58 }
 0x1da   : > { %v1235_v62 = vpop.f32.mrf.mxu1 }
 0x1db   : > { %752 = vst.msk [vmem:[%s1500_s18] sm:$0x7] %vm751_vm9, %v750_v60  ;;  %v824_v63 = vpop.f32.mrf.mxu0 }
 0x1dc   : > { %v828_v0 = vadd.f32 %v824_v63, %v753_v61 }
 0x1dd   : > { %v1270_v1 = vpop.f32.mrf.mxu0 }
 0x1de   : > { %829 = vst.msk [vmem:[%s1505_s14] sm:$0x7] %vm751_vm9, %v828_v0 }
 0x1df PF: > { %s16_s24 = sadd.s32 1, %s1385_s24   ;;  %s1727_s18 = smov %s1365_s19 }
 0x1e0   : > { %p13_p12 = scmp.ge.s32.totalorder %s16_s24, 6   ;;  %s1728_s19 = smov %s1472_s6 }
 0x1e1   : > { %s1729_s20 = smov %s1377_s22  ;;  %s1730_s21 = smov %s1381_s23 }
 0x1e2   : > { %s1731_s22 = smov %s1734_s25  ;;  %s1732_s23 = smov %s1738_s26 }
 0x1e3   :  { %15 = sbr.rel (!%p13_p12) target bundleno = 4 (0x4), region = 141 }

</bundles_post_ra>
